<compile_context>
chip_gen: v5e
topology: v5e:2x2
jax: 0.10.0
libtpu: 0.0.40
codegen_flags: <defaults>
</compile_context>

<pallas_src>
import math

import jax
import jax.numpy as jnp
from jax import lax
from jax.experimental import pallas as pl
from jax.experimental.pallas import tpu as pltpu


_MASK_VALUE = float(jnp.finfo(jnp.float32).min) * 0.5   # big finite negative


# ---------------------------------------------------------------------------
# Fused QKV projection:  (B*S, d_in) @ (d_in, 3*d_out)  ->  bf16 (B*S, 3*d_out)
# ---------------------------------------------------------------------------
def _qkv_proj_kernel(x_ref, w_ref, o_ref):
    o_ref[...] = jnp.dot(x_ref[...], w_ref[...],
                         preferred_element_type=jnp.float32).astype(o_ref.dtype)


def _qkv_projection(x2d, w_cat, *, block_m=256):
    M, d_in = x2d.shape
    n3 = w_cat.shape[1]
    tm = block_m if (M % block_m == 0) else M   # full-extent block is always legal
    return pl.pallas_call(
        _qkv_proj_kernel,
        out_shape=jax.ShapeDtypeStruct((M, n3), jnp.bfloat16),
        grid_spec=pltpu.PrefetchScalarGridSpec(
            num_scalar_prefetch=0,
            grid=(M // tm,),
            in_specs=[
                pl.BlockSpec((tm, d_in), lambda i: (i, 0)),
                pl.BlockSpec((d_in, n3), lambda i: (0, 0)),   # weight stays resident
            ],
            out_specs=pl.BlockSpec((tm, n3), lambda i: (i, 0)),
        ),
        compiler_params=pltpu.CompilerParams(dimension_semantics=("parallel",)),
    )(x2d, w_cat)


# ---------------------------------------------------------------------------
# Flash-style causal attention over pre-projected (bf16) q, k, v.
# Grid = (B, packed_steps) where packed_steps enumerate only ki <= qi.
# ---------------------------------------------------------------------------
def _flash_causal_kernel(qi_map_ref, ki_map_ref, q_ref, k_ref, v_ref, o_ref,
                         m_sc, l_sc, acc_sc):
    step = pl.program_id(1)
    qi = qi_map_ref[step]
    ki = ki_map_ref[step]
    tq = q_ref.shape[1]
    tkv = k_ref.shape[1]

    # ---- init per q tile: reset online-softmax state
    @pl.when(ki == 0)
    def _init():
        m_sc[...] = jnp.full_like(m_sc, _MASK_VALUE)
        l_sc[...] = jnp.zeros_like(l_sc)
        acc_sc[...] = jnp.zeros_like(acc_sc)

    def _scores():
        # (tq, tkv): contract last dims of q and k (MXU-native, no k transpose).
        # Scale already folded into Wq.
        return lax.dot_general(q_ref[0], k_ref[0],
                               dimension_numbers=(((1,), (1,)), ((), ())),
                               preferred_element_type=jnp.float32)

    def _update(s):
        m_prev = m_sc[...]
        m_new = jnp.maximum(m_prev, jnp.max(s, axis=-1, keepdims=True))
        alpha = jnp.exp(m_prev - m_new)
        p = jnp.exp(s - m_new)
        l_sc[...] = alpha * l_sc[...] + jnp.sum(p, axis=-1, keepdims=True)
        acc_sc[...] = alpha * acc_sc[...] + jnp.dot(
            p.astype(jnp.bfloat16), v_ref[0], preferred_element_type=jnp.float32)
        m_sc[...] = m_new

    # ---- strictly-below-diagonal tiles: unmasked fast path
    @pl.when(ki < qi)
    def _below_diag():
        _update(_scores())

    # ---- diagonal-straddling tile (tq == tkv): mask, update, finalize.
    # With triangle packing this is always the LAST kv step for this q tile.
    @pl.when(ki == qi)
    def _diag_and_finalize():
        s = _scores()
        row = lax.broadcasted_iota(jnp.int32, (tq, tkv), 0)
        col = lax.broadcasted_iota(jnp.int32, (tq, tkv), 1)
        s = jnp.where(col > row, _MASK_VALUE, s)
        _update(s)
        # TODO(synk): nn.Dropout(p) on attention weights omitted (eval-mode identity).
        inv_l = pl.reciprocal(l_sc[...], approx=True)   # EUP slot, ~free
        o_ref[0] = (acc_sc[...] * inv_l).astype(o_ref.dtype)


def _flash_attention(q, k, v, *, out_dtype, block, vmem_limit_bytes=None):
    B, S, d_out = q.shape
    t = min(block, S)
    assert S % t == 0, "sequence length must divide into tiles"
    n = S // t

    # Triangle-packed step -> (qi, ki) maps (only lower-triangular tiles).
    qi_list, ki_list = [], []
    for qi in range(n):
        for ki in range(qi + 1):
            qi_list.append(qi)
            ki_list.append(ki)
    qi_map = jnp.asarray(qi_list, dtype=jnp.int32)
    ki_map = jnp.asarray(ki_list, dtype=jnp.int32)
    steps = len(qi_list)

    return pl.pallas_call(
        _flash_causal_kernel,
        out_shape=jax.ShapeDtypeStruct((B, S, d_out), out_dtype),
        grid_spec=pltpu.PrefetchScalarGridSpec(
            num_scalar_prefetch=2,
            grid=(B, steps),
            in_specs=[
                pl.BlockSpec((1, t, d_out), lambda b, s, qi_m, ki_m: (b, qi_m[s], 0)),
                pl.BlockSpec((1, t, d_out), lambda b, s, qi_m, ki_m: (b, ki_m[s], 0)),
                pl.BlockSpec((1, t, d_out), lambda b, s, qi_m, ki_m: (b, ki_m[s], 0)),
            ],
            out_specs=pl.BlockSpec((1, t, d_out), lambda b, s, qi_m, ki_m: (b, qi_m[s], 0)),
            scratch_shapes=[
                pltpu.VMEM((t, 1), jnp.float32),       # running max  m
                pltpu.VMEM((t, 1), jnp.float32),       # running sum  l
                pltpu.VMEM((t, d_out), jnp.float32),   # output accumulator
            ],
        ),
        compiler_params=pltpu.CompilerParams(
            dimension_semantics=("parallel", "arbitrary"),
            vmem_limit_bytes=vmem_limit_bytes),
    )(qi_map, ki_map, q, k, v)


# ---------------------------------------------------------------------------
# Public wrapper matching the PyTorch module's forward (eval mode).
# ---------------------------------------------------------------------------
def causal_self_attention(x, wq, wk, wv, *, block=128, vmem_limit_bytes=None):
    """x: (B, S, d_in); wq/wk/wv pre-transposed (d_in, d_out). Returns (B, S, d_out)."""
    B, S, d_in = x.shape
    d_out = wq.shape[1]
    scale = 1.0 / math.sqrt(d_out)

    # Fold softmax scale into Wq (zero runtime cost); bf16 MXU operands, f32 acc.
    w_cat = jnp.concatenate([wq * scale, wk, wv], axis=1).astype(jnp.bfloat16)
    x_b = x.astype(jnp.bfloat16)

    qkv = _qkv_projection(x_b.reshape(B * S, d_in), w_cat)
    qkv = qkv.reshape(B, S, 3 * d_out)
    q = qkv[..., :d_out]
    k = qkv[..., d_out:2 * d_out]
    v = qkv[..., 2 * d_out:]

    return _flash_attention(q, k, v, out_dtype=x.dtype, block=block,
                            vmem_limit_bytes=vmem_limit_bytes)


def reference_attention(x, wq, wk, wv):
    """Pure-JAX f32 reference mirroring the PyTorch forward (eval mode)."""
    q = x @ wq
    k = x @ wk
    v = x @ wv
    S = x.shape[1]
    scale = 1.0 / math.sqrt(q.shape[-1])
    scores = jnp.einsum("bqd,bkd->bqk", q, k) * scale
    causal = jnp.triu(jnp.ones((S, S), dtype=bool), k=1)
    scores = jnp.where(causal[None], -jnp.inf, scores)
    w = jax.nn.softmax(scores, axis=-1)
    return jnp.einsum("bqk,bkd->bqd", w, v)


if __name__ == "__main__":
    # Small shapes consistent with the module.
    B, S, d_in, d_out = 2, 64, 64, 128
    ctx_len = 128   # module's causal-mask buffer covers >= S
    dropout = 0.0   # eval mode

    key = jax.random.PRNGKey(0)
    kx, kq, kk, kv = jax.random.split(key, 4)

    x = jax.random.normal(kx, (B, S, d_in), dtype=jnp.float32)
    # nn.Linear weights stored pre-transposed as (d_in, d_out); qkv_bias=False.
    wq = jax.random.normal(kq, (d_in, d_out), dtype=jnp.float32) * 0.1
    wk = jax.random.normal(kk, (d_in, d_out), dtype=jnp.float32) * 0.1
    wv = jax.random.normal(kv, (d_in, d_out), dtype=jnp.float32) * 0.1

    # Small tile so the test exercises the triangle-packed grid, the masked
    # diagonal tile path and the online-softmax accumulation (production: 128+,
    # 256 on v6e/v7x).
    out = causal_self_attention(x, wq, wk, wv, block=16)
    out = jax.block_until_ready(out)

    ref = reference_attention(x, wq, wk, wv)
    assert out.shape == (B, S, d_out)
    # bf16 MXU operands (f32 accumulation) + approx reciprocal -> relaxed tol.
    err = jnp.max(jnp.abs(out - ref))
    assert jnp.allclose(out, ref, atol=2e-2, rtol=2e-2), f"mismatch, max abs err={err}"

    print("KERNEL_OK")
</pallas_src>

<mosaic_0001>
module attributes {stable_mosaic.version = 11 : i64} {
  func.func @_qkv_proj_kernel(%arg0: i32, %arg1: memref<128x64xbf16, #tpu.memory_space<vmem>>, %arg2: memref<64x384xbf16, #tpu.memory_space<vmem>>, %arg3: memref<128x384xbf16, #tpu.memory_space<vmem>>) attributes {dimension_semantics = [#tpu.dimension_semantics<parallel>], iteration_bounds = array<i64: 1>, scalar_prefetch = 0 : i64, scratch_operands = 0 : i64, tpu.core_type = #tpu.core_type<tc>, window_params = [{transform_indices = @transform_0, window_bounds = array<i64: 128, 64>}, {pipeline_mode = #tpu.pipeline_mode<synchronous>, transform_indices = @transform_1, window_bounds = array<i64: 64, 384>}, {transform_indices = @transform_2, window_bounds = array<i64: 128, 384>}]} {
    %c0 = arith.constant 0 : index
    %c0_0 = arith.constant 0 : index
    %0 = vector.load %arg1[%c0, %c0_0] : memref<128x64xbf16, #tpu.memory_space<vmem>>, vector<128x64xbf16>
    %c0_1 = arith.constant 0 : index
    %c0_2 = arith.constant 0 : index
    %1 = vector.load %arg2[%c0_1, %c0_2] : memref<64x384xbf16, #tpu.memory_space<vmem>>, vector<64x384xbf16>
    %cst = arith.constant dense<0.000000e+00> : vector<128x384xf32>
    %2 = tpu.matmul %0, %1, %cst {dimension_numbers = #tpu.dot_dimension_numbers<[1], [0], [0], [1], [0, 0, 1, 1], [], []>} : vector<128x64xbf16>, vector<64x384xbf16>, vector<128x384xf32> -> vector<128x384xf32>
    %3 = arith.truncf %2 : vector<128x384xf32> to vector<128x384xbf16>
    %c0_3 = arith.constant 0 : index
    %c0_4 = arith.constant 0 : index
    %4 = vector.load %arg3[%c0_3, %c0_4] : memref<128x384xbf16, #tpu.memory_space<vmem>>, vector<128x384xbf16>
    tpu.vector_store %arg3[%c0_3, %c0_4], %3 {strides = array<i32>} : memref<128x384xbf16, #tpu.memory_space<vmem>>, vector<128x384xbf16>,
    return
  }
  func.func @transform_0(%arg0: i32) -> (i32, i32) {
    %c0_i32 = arith.constant 0 : i32
    %c0_i32_0 = arith.constant 0 : i32
    return %arg0, %c0_i32 : i32, i32
  }
  func.func @transform_1(%arg0: i32) -> (i32, i32) {
    %c0_i32 = arith.constant 0 : i32
    %c0_i32_0 = arith.constant 0 : i32
    %c0_i32_1 = arith.constant 0 : i32
    return %c0_i32, %c0_i32_0 : i32, i32
  }
  func.func @transform_2(%arg0: i32) -> (i32, i32) {
    %c0_i32 = arith.constant 0 : i32
    %c0_i32_0 = arith.constant 0 : i32
    return %arg0, %c0_i32 : i32, i32
  }
}

</mosaic_0001>

<bundles_post_ra>
// kernel: tpu_custom_call.1
= control target key start
LH: loop header
LB: loop body
LE: loop exit
PB: predicated region body
PF: predicated region fallthrough
CT: control target
= control target key end

     0   :  { %s709_s0 = inlined_call_operand.vmem [shape: bf16[128,64], index: 0, kind: input, shape index: {}]   ;;  %s710_s1 = inlined_call_operand.vmem [shape: bf16[64,384], index: 1, kind: input, shape index: {}]   ;;  %s711_s2 = inlined_call_operand.hbm [shape: bf16[128,384], index: 2, kind: output, shape index: {}]  }
   0x1   :  { %v473_v0 = vld [vmem:[%s710_s1 + $0x48] sm:$0xf]  ;;  %v525_v1 = vld [vmem:[%s710_s1 + $0x50] sm:$0xf0]  ;;  %v524_v2 = vld [vmem:[%s710_s1 + $0x4c] sm:$0xf] }
   0x2   :  { %v474_v3 = vor.u32 %v525_v1, %v473_v0  ;;  %v475_v4 = vld [vmem:[%s710_s1 + $0x54] sm:$0xf0]  ;;  %v481_v5 = vld [vmem:[%s710_s1 + $0x50] sm:$0xf]  ;;  %v526_v6 = vld [vmem:[%s710_s1 + $0x58] sm:$0xf0] }
   0x3   :  { %v478_v7 = vor.u32 %v524_v2, %v475_v4  ;;  %v482_v8 = vor.u32 %v526_v6, %v481_v5  ;;  %v461_v9 = vld [vmem:[%s710_s1 + $0x30] sm:$0xf]  ;;  %v522_v10 = vld [vmem:[%s710_s1 + $0x38] sm:$0xf0]  ;;  %v521_v11 = vld [vmem:[%s710_s1 + $0x34] sm:$0xf] }
   0x4   :  { %178 = vmatpush.bf16.msra.mxu0 %v474_v3  ;;  %527 = vmatpush.bf16.msra.mxu3 %v474_v3  ;;  %v462_v12 = vor.u32 %v522_v10, %v461_v9  ;;  %v463_v13 = vld [vmem:[%s710_s1 + $0x3c] sm:$0xf0]  ;;  %v469_v14 = vld [vmem:[%s710_s1 + $0x38] sm:$0xf]  ;;  %v523_v15 = vld [vmem:[%s710_s1 + $0x40] sm:$0xf0] }
   0x5   :  { %227 = vmatpush.bf16.msra.mxu1 %v478_v7  ;;  %276 = vmatpush.bf16.msra.mxu2 %v482_v8  ;;  %v466_v16 = vor.u32 %v521_v11, %v463_v13  ;;  %v470_v17 = vor.u32 %v523_v15, %v469_v14  ;;  %v449_v18 = vld [vmem:[%s710_s1 + $0x18] sm:$0xf]  ;;  %v519_v19 = vld [vmem:[%s710_s1 + $0x20] sm:$0xf0]  ;;  %v518_v20 = vld [vmem:[%s710_s1 + $0x1c] sm:$0xf] }
   0x6   :  { %v451_v21 = vld [vmem:[%s710_s1 + $0x24] sm:$0xf0]  ;;  %v457_v22 = vld [vmem:[%s710_s1 + $0x20] sm:$0xf]  ;;  %v520_v23 = vld [vmem:[%s710_s1 + $0x28] sm:$0xf0]  ;;  %v450_v24 = vor.u32 %v519_v19, %v449_v18 }
   0x7   :  { %v437_v25 = vld [vmem:[%s710_s1] sm:$0xf]  ;;  %v454_v26 = vor.u32 %v518_v20, %v451_v21  ;;  %v458_v27 = vor.u32 %v520_v23, %v457_v22  ;;  %v516_v28 = vld [vmem:[%s710_s1 + $0x8] sm:$0xf0]  ;;  %v515_v29 = vld [vmem:[%s710_s1 + $0x4] sm:$0xf] }
   0x8   :  { %179 = vmatpush.bf16.msra.mxu0 %v462_v12  ;;  %528 = vmatpush.bf16.msra.mxu3 %v462_v12  ;;  %v439_v30 = vld [vmem:[%s710_s1 + $0xc] sm:$0xf0]  ;;  %v445_v31 = vld [vmem:[%s710_s1 + $0x8] sm:$0xf]  ;;  %v517_v32 = vld [vmem:[%s710_s1 + $0x10] sm:$0xf0] }
   0x9   :  { %228 = vmatpush.bf16.msra.mxu1 %v466_v16  ;;  %277 = vmatpush.bf16.msra.mxu2 %v470_v17 }
   0xa   :  { %7 = vsyncpa [#allocation3], 0  ;;  %v438_v33 = vor.u32 %v516_v28, %v437_v25  ;;  %v442_v34 = vor.u32 %v515_v29, %v439_v30  ;;  %v446_v35 = vor.u32 %v517_v32, %v445_v31  ;;  %v507_v36 = vld [vmem:[%s709_s0] sm:$0xff]  ;;  %v513_v37 = vld [vmem:[%s709_s0 + $0x30] sm:$0xff]  ;;  %vm149_vm0 = vcmask 523264   ;;  %s391_s19 = sshll.u32 %s711_s2, 4  ;;  %s392_s19 = int_to_ptr.hbm [resolvable:$true] %s391_s19 }
   0xb   :  { %v508_v38 = vld [vmem:[%s709_s0 + $0x8] sm:$0xff]  ;;  %v514_v39 = vld [vmem:[%s709_s0 + $0x38] sm:$0xff]  ;;  %v509_v40 = vld [vmem:[%s709_s0 + $0x10] sm:$0xff]  ;;  %s569_s20 = smov 192   ;;  %s570_s21 = smov 12  }
   0xc   :  { %180 = vmatpush.bf16.msra.mxu0 %v450_v24  ;;  %529 = vmatpush.bf16.msra.mxu3 %v450_v24  ;;  %v510_v41 = vld [vmem:[%s709_s0 + $0x18] sm:$0xff]  ;;  %v511_v42 = vld [vmem:[%s709_s0 + $0x20] sm:$0xff]  ;;  %v512_v43 = vld [vmem:[%s709_s0 + $0x28] sm:$0xff]  ;;  %s568_s0 = smov [#allocation2]  }
   0xd   :  { %229 = vmatpush.bf16.msra.mxu1 %v454_v26  ;;  %278 = vmatpush.bf16.msra.mxu2 %v458_v27  ;;  %s389_s16 = sshll.u32 %s568_s0, 4  ;;  %s390_s16 = int_to_ptr.vmem [resolvable:$true] %s389_s16 }
  0x10   :  { %181 = vmatpush.bf16.msra.mxu0 %v438_v33  ;;  %530 = vmatpush.bf16.msra.mxu3 %v438_v33 }
  0x11   :  { %230 = vmatpush.bf16.msra.mxu1 %v442_v34  ;;  %279 = vmatpush.bf16.msra.mxu2 %v446_v35 }
  0x13   :  { %483 = vmatmul.msk.bf16.vlgmr.msra.gmra.mxu0 %vm149_vm0, %v507_v36  ;;  %489 = vmatmul.msk.bf16.vlgmr.msra.gmra.mxu3 %vm149_vm0, %v513_v37 }
  0x14   :  { %531 = vmatpush.bf16.msrb.mxu3 %v478_v7  ;;  %491 = vmatmul.msk.bf16.vlgmr.msra.gmra.mxu1 %vm149_vm0, %v507_v36 }
  0x15   :  { %499 = vmatmul.msk.bf16.vlgmr.msra.gmra.mxu2 %vm149_vm0, %v507_v36 }
  0x18   :  { %532 = vmatpush.bf16.msrb.mxu3 %v466_v16 }
  0x1c   :  { %533 = vmatpush.bf16.msrb.mxu3 %v454_v26 }
  0x20   :  { %534 = vmatpush.bf16.msrb.mxu3 %v442_v34 }
  0x23   :  { %484 = vmatmul.msk.bf16.gmra.mxu0 %vm149_vm0, %v508_v38  ;;  %490 = vmatmul.msk.bf16.gmra.mxu3 %vm149_vm0, %v514_v39 }
  0x24   :  { %535 = vmatpush.bf16.msra.mxu3 %v482_v8  ;;  %492 = vmatmul.msk.bf16.gmra.mxu1 %vm149_vm0, %v508_v38 }
  0x25   :  { %500 = vmatmul.msk.bf16.gmra.mxu2 %vm149_vm0, %v508_v38 }
  0x28   :  { %536 = vmatpush.bf16.msra.mxu3 %v470_v17 }
  0x2c   :  { %537 = vmatpush.bf16.msra.mxu3 %v458_v27 }
  0x30   :  { %538 = vmatpush.bf16.msra.mxu3 %v446_v35 }
  0x33   :  { %485 = vmatmul.msk.bf16.gmra.mxu0 %vm149_vm0, %v509_v40  ;;  %497 = vmatmul.msk.bf16.vlgmr.msrb.gmra.mxu3 %vm149_vm0, %v513_v37 }
  0x34   :  { %493 = vmatmul.msk.bf16.gmra.mxu1 %vm149_vm0, %v509_v40 }
  0x35   :  { %501 = vmatmul.msk.bf16.gmra.mxu2 %vm149_vm0, %v509_v40 }
  0x43   :  { %486 = vmatmul.msk.bf16.gmra.mxu0 %vm149_vm0, %v510_v41  ;;  %498 = vmatmul.msk.bf16.gmra.mxu3 %vm149_vm0, %v514_v39 }
  0x44   :  { %494 = vmatmul.msk.bf16.gmra.mxu1 %vm149_vm0, %v510_v41 }
  0x45   :  { %502 = vmatmul.msk.bf16.gmra.mxu2 %vm149_vm0, %v510_v41 }
  0x53   :  { %487 = vmatmul.msk.bf16.gmra.mxu0 %vm149_vm0, %v511_v42  ;;  %505 = vmatmul.msk.bf16.vlgmr.msra.gmra.mxu3 %vm149_vm0, %v513_v37 }
  0x54   :  { %495 = vmatmul.msk.bf16.gmra.mxu1 %vm149_vm0, %v511_v42 }
  0x55   :  { %503 = vmatmul.msk.bf16.gmra.mxu2 %vm149_vm0, %v511_v42 }
  0x63   :  { %488 = vmatmul.msk.bf16.gmra.mxu0 %vm149_vm0, %v512_v43  ;;  %506 = vmatmul.msk.bf16.gmra.mxu3 %vm149_vm0, %v514_v39 }
  0x64   :  { %496 = vmatmul.msk.bf16.gmra.mxu1 %vm149_vm0, %v512_v43 }
  0x65   :  { %504 = vmatmul.msk.bf16.gmra.mxu2 %vm149_vm0, %v512_v43 }
  0x90   :  { %v183_v44 = vpop.f32.mrf.mxu0 }
  0x91   :  { %v232_v45 = vpop.f32.mrf.mxu1 }
  0x92   :  { %v321_v46 = vpack.c.bf16 %v232_v45, %v183_v44 }
  0x94   :  { %353 = vst [vmem:[#allocation2] sm:$0xff] %v321_v46 }
  0x96   :  { %v213_v47 = vpop.f32.mrf.mxu3 }
  0x98   :  { %v281_v48 = vpop.f32.mrf.mxu2  ;;  %v185_v50 = vpop.f32.mrf.mxu0 }
  0x99   :  { %v322_v49 = vpack.c.bf16 %v281_v48, %v281_v48  ;;  %v234_v51 = vpop.f32.mrf.mxu1 }
  0x9a   :  { %v323_v52 = vpack.c.bf16 %v234_v51, %v185_v50 }
  0x9b   :  { %354 = vst [vmem:[#allocation2 + $0x8] sm:$0xf] %v322_v49 }
  0x9c   :  { %355 = vst [vmem:[#allocation2 + $0xc] sm:$0xff] %v323_v52 }
  0x9e   :  { %v215_v53 = vpop.f32.mrf.mxu3 }
  0xa0   :  { %v283_v54 = vpop.f32.mrf.mxu2  ;;  %v188_v56 = vpop.f32.mrf.mxu0 }
  0xa1   :  { %v324_v55 = vpack.c.bf16 %v283_v54, %v283_v54  ;;  %v237_v57 = vpop.f32.mrf.mxu1 }
  0xa2   :  { %v325_v58 = vpack.c.bf16 %v237_v57, %v188_v56 }
  0xa3   :  { %356 = vst [vmem:[#allocation2 + $0x14] sm:$0xf] %v324_v55 }
  0xa4   :  { %357 = vst [vmem:[#allocation2 + $0x18] sm:$0xff] %v325_v58 }
  0xa6   :  { %v218_v59 = vpop.f32.mrf.mxu3 }
  0xa8   :  { %v286_v60 = vpop.f32.mrf.mxu2  ;;  %v190_v62 = vpop.f32.mrf.mxu0 }
  0xa9   :  { %v326_v61 = vpack.c.bf16 %v286_v60, %v286_v60  ;;  %v239_v63 = vpop.f32.mrf.mxu1 }
  0xaa   :  { %v327_v0 = vpack.c.bf16 %v239_v63, %v190_v62 }
  0xab   :  { %358 = vst [vmem:[#allocation2 + $0x20] sm:$0xf] %v326_v61 }
  0xac   :  { %359 = vst [vmem:[#allocation2 + $0x24] sm:$0xff] %v327_v0 }
  0xae   :  { %v220_v1 = vpop.f32.mrf.mxu3 }
  0xb0   :  { %v288_v2 = vpop.f32.mrf.mxu2  ;;  %v193_v4 = vpop.f32.mrf.mxu0 }
  0xb1   :  { %v328_v3 = vpack.c.bf16 %v288_v2, %v288_v2  ;;  %v242_v5 = vpop.f32.mrf.mxu1 }
  0xb2   :  { %v329_v6 = vpack.c.bf16 %v242_v5, %v193_v4 }
  0xb3   :  { %360 = vst [vmem:[#allocation2 + $0x2c] sm:$0xf] %v328_v3 }
  0xb4   :  { %361 = vst [vmem:[#allocation2 + $0x30] sm:$0xff] %v329_v6 }
  0xb6   :  { %v262_v7 = vpop.f32.mrf.mxu3 }
  0xb7   :  { %v345_v8 = vpack.c.bf16 %v262_v7, %v213_v47 }
  0xb8   :  { %v291_v9 = vpop.f32.mrf.mxu2  ;;  %v195_v11 = vpop.f32.mrf.mxu0 }
  0xb9   :  { %v330_v10 = vpack.c.bf16 %v291_v9, %v291_v9  ;;  %377 = vst [vmem:[#allocation2 + $0x90] sm:$0xff] %v345_v8  ;;  %v244_v12 = vpop.f32.mrf.mxu1 }
  0xba   :  { %v331_v13 = vpack.c.bf16 %v244_v12, %v195_v11 }
  0xbb   :  { %362 = vst [vmem:[#allocation2 + $0x38] sm:$0xf] %v330_v10 }
  0xbc   :  { %363 = vst [vmem:[#allocation2 + $0x3c] sm:$0xff] %v331_v13 }
  0xbe   :  { %v264_v14 = vpop.f32.mrf.mxu3 }
  0xbf   :  { %v347_v15 = vpack.c.bf16 %v264_v14, %v215_v53 }
  0xc0   :  { %v293_v16 = vpop.f32.mrf.mxu2  ;;  %v198_v18 = vpop.f32.mrf.mxu0 }
  0xc1   :  { %v332_v17 = vpack.c.bf16 %v293_v16, %v293_v16  ;;  %379 = vst [vmem:[#allocation2 + $0x9c] sm:$0xff] %v347_v15  ;;  %v247_v19 = vpop.f32.mrf.mxu1 }
  0xc2   :  { %v333_v20 = vpack.c.bf16 %v247_v19, %v198_v18 }
  0xc3   :  { %364 = vst [vmem:[#allocation2 + $0x44] sm:$0xf] %v332_v17 }
  0xc4   :  { %365 = vst [vmem:[#allocation2 + $0x48] sm:$0xff] %v333_v20 }
  0xc6   :  { %v267_v21 = vpop.f32.mrf.mxu3 }
  0xc7   :  { %v349_v22 = vpack.c.bf16 %v267_v21, %v218_v59 }
  0xc8   :  { %v296_v23 = vpop.f32.mrf.mxu2  ;;  %v200_v25 = vpop.f32.mrf.mxu0 }
  0xc9   :  { %v334_v24 = vpack.c.bf16 %v296_v23, %v296_v23  ;;  %381 = vst [vmem:[#allocation2 + $0xa8] sm:$0xff] %v349_v22  ;;  %v249_v26 = vpop.f32.mrf.mxu1 }
  0xca   :  { %v335_v27 = vpack.c.bf16 %v249_v26, %v200_v25 }
  0xcb   :  { %366 = vst [vmem:[#allocation2 + $0x50] sm:$0xf] %v334_v24 }
  0xcc   :  { %367 = vst [vmem:[#allocation2 + $0x54] sm:$0xff] %v335_v27 }
  0xce   :  { %v269_v28 = vpop.f32.mrf.mxu3 }
  0xcf   :  { %v351_v29 = vpack.c.bf16 %v269_v28, %v220_v1 }
  0xd0   :  { %v298_v30 = vpop.f32.mrf.mxu2  ;;  %v203_v32 = vpop.f32.mrf.mxu0 }
  0xd1   :  { %v336_v31 = vpack.c.bf16 %v298_v30, %v298_v30  ;;  %383 = vst [vmem:[#allocation2 + $0xb4] sm:$0xff] %v351_v29  ;;  %v252_v33 = vpop.f32.mrf.mxu1 }
  0xd2   :  { %v337_v34 = vpack.c.bf16 %v252_v33, %v203_v32 }
  0xd3   :  { %368 = vst [vmem:[#allocation2 + $0x5c] sm:$0xf] %v336_v31 }
  0xd4   :  { %369 = vst [vmem:[#allocation2 + $0x60] sm:$0xff] %v337_v34 }
  0xd6   :  { %v311_v35 = vpop.f32.mrf.mxu3 }
  0xd7   :  { %v346_v37 = vpack.c.bf16 %v311_v35, %v311_v35 }
  0xd8   :  { %v301_v36 = vpop.f32.mrf.mxu2  ;;  %v205_v39 = vpop.f32.mrf.mxu0 }
  0xd9   :  { %v338_v38 = vpack.c.bf16 %v301_v36, %v301_v36  ;;  %378 = vst [vmem:[#allocation2 + $0x98] sm:$0xf] %v346_v37  ;;  %v254_v40 = vpop.f32.mrf.mxu1 }
  0xda   :  { %v339_v41 = vpack.c.bf16 %v254_v40, %v205_v39 }
  0xdb   :  { %370 = vst [vmem:[#allocation2 + $0x68] sm:$0xf] %v338_v38 }
  0xdc   :  { %371 = vst [vmem:[#allocation2 + $0x6c] sm:$0xff] %v339_v41 }
  0xde   :  { %v313_v42 = vpop.f32.mrf.mxu3 }
  0xdf   :  { %v348_v44 = vpack.c.bf16 %v313_v42, %v313_v42 }
  0xe0   :  { %v303_v43 = vpop.f32.mrf.mxu2  ;;  %v208_v46 = vpop.f32.mrf.mxu0 }
  0xe1   :  { %v340_v45 = vpack.c.bf16 %v303_v43, %v303_v43  ;;  %380 = vst [vmem:[#allocation2 + $0xa4] sm:$0xf] %v348_v44  ;;  %v257_v47 = vpop.f32.mrf.mxu1 }
  0xe2   :  { %v341_v48 = vpack.c.bf16 %v257_v47, %v208_v46 }
  0xe3   :  { %372 = vst [vmem:[#allocation2 + $0x74] sm:$0xf] %v340_v45 }
  0xe4   :  { %373 = vst [vmem:[#allocation2 + $0x78] sm:$0xff] %v341_v48 }
  0xe6   :  { %v316_v49 = vpop.f32.mrf.mxu3 }
  0xe7   :  { %v350_v51 = vpack.c.bf16 %v316_v49, %v316_v49 }
  0xe8   :  { %v306_v50 = vpop.f32.mrf.mxu2  ;;  %v210_v53 = vpop.f32.mrf.mxu0 }
  0xe9   :  { %v342_v52 = vpack.c.bf16 %v306_v50, %v306_v50  ;;  %382 = vst [vmem:[#allocation2 + $0xb0] sm:$0xf] %v350_v51  ;;  %v259_v54 = vpop.f32.mrf.mxu1 }
  0xea   :  { %v343_v55 = vpack.c.bf16 %v259_v54, %v210_v53 }
  0xeb   :  { %374 = vst [vmem:[#allocation2 + $0x80] sm:$0xf] %v342_v52 }
  0xec   :  { %375 = vst [vmem:[#allocation2 + $0x84] sm:$0xff] %v343_v55 }
  0xee   :  { %v318_v56 = vpop.f32.mrf.mxu3 }
  0xef   :  { %v352_v58 = vpack.c.bf16 %v318_v56, %v318_v56 }
  0xf0   :  { %v308_v57 = vpop.f32.mrf.mxu2 }
  0xf1   :  { %v344_v59 = vpack.c.bf16 %v308_v57, %v308_v57  ;;  %384 = vst [vmem:[#allocation2 + $0xbc] sm:$0xf] %v352_v58 }
  0xf3   :  { %376 = vst [vmem:[#allocation2 + $0x8c] sm:$0xf] %v344_v59 }
  0xf4   :  { %397 = dma.vmem_to_hbm [thread:$0]  %s390_s16, 3072, %s392_s19, [#allocation3], %s569_s20, %s569_s20, %s570_s21  }
  0xf5   :  { %566 = dma.done.wait [#allocation3], 3072  }
  0xf6   :  { %567 = vsyncadd [#allocation3], 4294964224 }
  0xf7   :  { %402 = vsyncpa [#allocation3], 1 }

</bundles_post_ra>
